<compile_context>
chip_gen: v7x
topology: tpu7x:2x2x1
jax: 0.10.0
libtpu: 0.0.40
codegen_flags: <defaults>
</compile_context>

<pallas_src>
import functools

import jax
import jax.numpy as jnp
from jax.experimental import pallas as pl
from jax.experimental.pallas import tpu as pltpu

_LANE = 128   # vreg lane width
_SUB = 16     # row-tile granularity (bf16 sublane packing: (16, 128))


def _round_up(x, m):
    return (x + m - 1) // m * m


def relation_encoder_kernel(x_ref, w1_ref, b1_ref, w2_ref, b2_ref,
                            w3_ref, b3_ref, o_ref):
    # Layer 1: bf16 operands -> f32 accumulate on the MXU, f32 epilogue.
    h = jnp.dot(x_ref[...], w1_ref[...], preferred_element_type=jnp.float32)
    h = jnp.maximum(h + b1_ref[...], 0.0)
    # Layer 2.
    h = jnp.dot(h.astype(w2_ref.dtype), w2_ref[...],
                preferred_element_type=jnp.float32)
    h = jnp.maximum(h + b2_ref[...], 0.0)
    # Layer 3 (output layer; the final ReLU is part of the reference module).
    h = jnp.dot(h.astype(w3_ref.dtype), w3_ref[...],
                preferred_element_type=jnp.float32)
    h = jnp.maximum(h + b3_ref[...], 0.0)
    o_ref[...] = h.astype(o_ref.dtype)


def _pad2d(a, rows, cols, dtype):
    """Zero-pad a 2-D array up to (rows, cols) in `dtype`, copy-free when
    already the right shape and dtype."""
    a = a.astype(dtype)
    if a.shape == (rows, cols):
        return a
    out = jnp.zeros((rows, cols), dtype)
    return out.at[:a.shape[0], :a.shape[1]].set(a)


@functools.partial(jax.jit, static_argnames=("tile_m", "compute_dtype"))
def relation_encoder(x, params, tile_m=256, compute_dtype=jnp.bfloat16):
    """x: [n_relations, input_size] -> [n_relations, output_size].

    tile_m guidance: 256-512 on v6e/v7x, 128-256 on v5e; it is clamped to the
    (sublane-rounded) row count so tiny inputs run as a single grid step.
    """
    w1, b1, w2, b2, w3, b3 = params
    n, d_in = x.shape
    hidden = w1.shape[1]
    d_out = w3.shape[1]

    # ---- lane-dense feature padding (multiples of 128) -------------------
    d_in_p = _round_up(d_in, _LANE)
    hid_p = _round_up(hidden, _LANE)
    d_out_p = _round_up(d_out, _LANE)

    # ---- row tiling (pad ragged n up to a multiple of the tile) ----------
    tm = _round_up(min(tile_m, _round_up(n, _SUB)), _SUB)
    n_p = _round_up(n, tm)
    grid = (n_p // tm,)

    # ---- zero-pad operands (semantics preserved, see header comment) -----
    xp = _pad2d(x, n_p, d_in_p, compute_dtype)
    w1p = _pad2d(w1, d_in_p, hid_p, compute_dtype)
    w2p = _pad2d(w2, hid_p, hid_p, compute_dtype)
    w3p = _pad2d(w3, hid_p, d_out_p, compute_dtype)
    b1p = _pad2d(b1.reshape(1, -1), 1, hid_p, jnp.float32)
    b2p = _pad2d(b2.reshape(1, -1), 1, hid_p, jnp.float32)
    b3p = _pad2d(b3.reshape(1, -1), 1, d_out_p, jnp.float32)

    in_specs = [
        pl.BlockSpec((tm, d_in_p), lambda i: (i, 0)),       # x tile (pipelined)
        pl.BlockSpec((d_in_p, hid_p), lambda i: (0, 0)),    # w1 (resident)
        pl.BlockSpec((1, hid_p), lambda i: (0, 0)),         # b1
        pl.BlockSpec((hid_p, hid_p), lambda i: (0, 0)),     # w2
        pl.BlockSpec((1, hid_p), lambda i: (0, 0)),         # b2
        pl.BlockSpec((hid_p, d_out_p), lambda i: (0, 0)),   # w3
        pl.BlockSpec((1, d_out_p), lambda i: (0, 0)),       # b3
    ]
    out_spec = pl.BlockSpec((tm, d_out_p), lambda i: (i, 0))  # lane-dense store

    out_padded = pl.pallas_call(
        relation_encoder_kernel,
        out_shape=jax.ShapeDtypeStruct((n_p, d_out_p), jnp.float32),
        grid=grid,
        in_specs=in_specs,
        out_specs=out_spec,
        compiler_params=pltpu.CompilerParams(
            dimension_semantics=("parallel",)),  # rows shard across v7x's 2 TCs
    )(xp, w1p, b1p, w2p, b2p, w3p, b3p)

    return out_padded[:n, :d_out].astype(x.dtype)


def init_params(key, input_size, hidden_size, output_size):
    """Deterministic init mimicking PyTorch nn.Linear defaults
    (uniform(-1/sqrt(fan_in), 1/sqrt(fan_in))). Weights stored as [in, out]."""
    def linear(k, fan_in, fan_out):
        kw, kb = jax.random.split(k)
        bound = 1.0 / jnp.sqrt(float(fan_in))
        w = jax.random.uniform(kw, (fan_in, fan_out), jnp.float32,
                               minval=-bound, maxval=bound)
        b = jax.random.uniform(kb, (1, fan_out), jnp.float32,
                               minval=-bound, maxval=bound)
        return w, b

    k1, k2, k3 = jax.random.split(key, 3)
    w1, b1 = linear(k1, input_size, hidden_size)
    w2, b2 = linear(k2, hidden_size, hidden_size)
    w3, b3 = linear(k3, hidden_size, output_size)
    return (w1, b1, w2, b2, w3, b3)


def relation_encoder_ref(x, params, compute_dtype=jnp.float32):
    """Pure-JAX reference; compute_dtype lets us mirror the bf16-operand path."""
    w1, b1, w2, b2, w3, b3 = params
    cd = compute_dtype
    h = jnp.dot(x.astype(cd), w1.astype(cd),
                preferred_element_type=jnp.float32) + b1
    h = jnp.maximum(h, 0.0)
    h = jnp.dot(h.astype(cd), w2.astype(cd),
                preferred_element_type=jnp.float32) + b2
    h = jnp.maximum(h, 0.0)
    h = jnp.dot(h.astype(cd), w3.astype(cd),
                preferred_element_type=jnp.float32) + b3
    return jnp.maximum(h, 0.0)


if __name__ == "__main__":
    key = jax.random.PRNGKey(0)
    k_x, k_p = jax.random.split(key)

    # Small shapes consistent with the module; n is deliberately ragged so the
    # padded multi-step grid path is exercised (grid=(3,) with tile_m=128).
    n_relations = 300
    input_size = 32
    hidden_size = 64
    output_size = 32

    x = jax.random.normal(k_x, (n_relations, input_size), jnp.float32)
    params = init_params(k_p, input_size, hidden_size, output_size)

    out = relation_encoder(x, params, tile_m=128)
    out = jax.block_until_ready(out)
    assert out.shape == (n_relations, output_size)

    # Check against the same bf16-operand / f32-accumulate math ...
    ref_bf16 = relation_encoder_ref(x, params, compute_dtype=jnp.bfloat16)
    assert jnp.allclose(out, ref_bf16, atol=1e-2, rtol=1e-2), \
        "mismatch vs bf16-operand reference"
    # ... and loosely against the full-f32 reference (bf16 operand rounding).
    ref_f32 = relation_encoder_ref(x, params, compute_dtype=jnp.float32)
    assert jnp.allclose(out, ref_f32, atol=5e-2, rtol=5e-2), \
        "mismatch vs f32 reference"

    print("KERNEL_OK")
</pallas_src>

<mosaic_0001>
module attributes {stable_mosaic.version = 11 : i64} {
  func.func @relation_encoder_kernel(%arg0: i32, %arg1: memref<128x128xbf16, #tpu.memory_space<vmem>>, %arg2: memref<128x128xbf16, #tpu.memory_space<vmem>>, %arg3: memref<1x128xf32, #tpu.memory_space<vmem>>, %arg4: memref<128x128xbf16, #tpu.memory_space<vmem>>, %arg5: memref<1x128xf32, #tpu.memory_space<vmem>>, %arg6: memref<128x128xbf16, #tpu.memory_space<vmem>>, %arg7: memref<1x128xf32, #tpu.memory_space<vmem>>, %arg8: memref<128x128xf32, #tpu.memory_space<vmem>>) attributes {dimension_semantics = [#tpu.dimension_semantics<parallel>], iteration_bounds = array<i64: 3>, scalar_prefetch = 0 : i64, scratch_operands = 0 : i64, tpu.core_type = #tpu.core_type<tc>, window_params = [{transform_indices = @transform_0, window_bounds = array<i64: 128, 128>}, {pipeline_mode = #tpu.pipeline_mode<synchronous>, transform_indices = @transform_1, window_bounds = array<i64: 128, 128>}, {pipeline_mode = #tpu.pipeline_mode<synchronous>, transform_indices = @transform_2, window_bounds = array<i64: 1, 128>}, {pipeline_mode = #tpu.pipeline_mode<synchronous>, transform_indices = @transform_3, window_bounds = array<i64: 128, 128>}, {pipeline_mode = #tpu.pipeline_mode<synchronous>, transform_indices = @transform_4, window_bounds = array<i64: 1, 128>}, {pipeline_mode = #tpu.pipeline_mode<synchronous>, transform_indices = @transform_5, window_bounds = array<i64: 128, 128>}, {pipeline_mode = #tpu.pipeline_mode<synchronous>, transform_indices = @transform_6, window_bounds = array<i64: 1, 128>}, {transform_indices = @transform_7, window_bounds = array<i64: 128, 128>}]} {
    %c0 = arith.constant 0 : index
    %c0_0 = arith.constant 0 : index
    %0 = vector.load %arg1[%c0, %c0_0] : memref<128x128xbf16, #tpu.memory_space<vmem>>, vector<128x128xbf16>
    %c0_1 = arith.constant 0 : index
    %c0_2 = arith.constant 0 : index
    %1 = vector.load %arg2[%c0_1, %c0_2] : memref<128x128xbf16, #tpu.memory_space<vmem>>, vector<128x128xbf16>
    %cst = arith.constant dense<0.000000e+00> : vector<128x128xf32>
    %2 = tpu.matmul %0, %1, %cst {dimension_numbers = #tpu.dot_dimension_numbers<[1], [0], [0], [1], [0, 0, 1, 1], [], []>} : vector<128x128xbf16>, vector<128x128xbf16>, vector<128x128xf32> -> vector<128x128xf32>
    %c0_3 = arith.constant 0 : index
    %c0_4 = arith.constant 0 : index
    %3 = vector.load %arg3[%c0_3, %c0_4] : memref<1x128xf32, #tpu.memory_space<vmem>>, vector<1x128xf32>
    %4 = vector.broadcast %3 : vector<1x128xf32> to vector<128x128xf32>
    %5 = arith.addf %2, %4 : vector<128x128xf32>
    %cst_5 = arith.constant 0.000000e+00 : f32
    %6 = vector.broadcast %cst_5 : f32 to vector<128x128xf32>
    %7 = arith.maximumf %5, %6 : vector<128x128xf32>
    %8 = arith.truncf %7 : vector<128x128xf32> to vector<128x128xbf16>
    %c0_6 = arith.constant 0 : index
    %c0_7 = arith.constant 0 : index
    %9 = vector.load %arg4[%c0_6, %c0_7] : memref<128x128xbf16, #tpu.memory_space<vmem>>, vector<128x128xbf16>
    %cst_8 = arith.constant dense<0.000000e+00> : vector<128x128xf32>
    %10 = tpu.matmul %8, %9, %cst_8 {dimension_numbers = #tpu.dot_dimension_numbers<[1], [0], [0], [1], [0, 0, 1, 1], [], []>} : vector<128x128xbf16>, vector<128x128xbf16>, vector<128x128xf32> -> vector<128x128xf32>
    %c0_9 = arith.constant 0 : index
    %c0_10 = arith.constant 0 : index
    %11 = vector.load %arg5[%c0_9, %c0_10] : memref<1x128xf32, #tpu.memory_space<vmem>>, vector<1x128xf32>
    %12 = vector.broadcast %11 : vector<1x128xf32> to vector<128x128xf32>
    %13 = arith.addf %10, %12 : vector<128x128xf32>
    %cst_11 = arith.constant 0.000000e+00 : f32
    %14 = vector.broadcast %cst_11 : f32 to vector<128x128xf32>
    %15 = arith.maximumf %13, %14 : vector<128x128xf32>
    %16 = arith.truncf %15 : vector<128x128xf32> to vector<128x128xbf16>
    %c0_12 = arith.constant 0 : index
    %c0_13 = arith.constant 0 : index
    %17 = vector.load %arg6[%c0_12, %c0_13] : memref<128x128xbf16, #tpu.memory_space<vmem>>, vector<128x128xbf16>
    %cst_14 = arith.constant dense<0.000000e+00> : vector<128x128xf32>
    %18 = tpu.matmul %16, %17, %cst_14 {dimension_numbers = #tpu.dot_dimension_numbers<[1], [0], [0], [1], [0, 0, 1, 1], [], []>} : vector<128x128xbf16>, vector<128x128xbf16>, vector<128x128xf32> -> vector<128x128xf32>
    %c0_15 = arith.constant 0 : index
    %c0_16 = arith.constant 0 : index
    %19 = vector.load %arg7[%c0_15, %c0_16] : memref<1x128xf32, #tpu.memory_space<vmem>>, vector<1x128xf32>
    %20 = vector.broadcast %19 : vector<1x128xf32> to vector<128x128xf32>
    %21 = arith.addf %18, %20 : vector<128x128xf32>
    %cst_17 = arith.constant 0.000000e+00 : f32
    %22 = vector.broadcast %cst_17 : f32 to vector<128x128xf32>
    %23 = arith.maximumf %21, %22 : vector<128x128xf32>
    %c0_18 = arith.constant 0 : index
    %c0_19 = arith.constant 0 : index
    %24 = vector.load %arg8[%c0_18, %c0_19] : memref<128x128xf32, #tpu.memory_space<vmem>>, vector<128x128xf32>
    tpu.vector_store %arg8[%c0_18, %c0_19], %23 {strides = array<i32>} : memref<128x128xf32, #tpu.memory_space<vmem>>, vector<128x128xf32>,
    return
  }
  func.func @transform_0(%arg0: i32) -> (i32, i32) {
    %c0_i32 = arith.constant 0 : i32
    %c0_i32_0 = arith.constant 0 : i32
    return %arg0, %c0_i32 : i32, i32
  }
  func.func @transform_1(%arg0: i32) -> (i32, i32) {
    %c0_i32 = arith.constant 0 : i32
    %c0_i32_0 = arith.constant 0 : i32
    %c0_i32_1 = arith.constant 0 : i32
    return %c0_i32, %c0_i32_0 : i32, i32
  }
  func.func @transform_2(%arg0: i32) -> (i32, i32) {
    %c0_i32 = arith.constant 0 : i32
    %c0_i32_0 = arith.constant 0 : i32
    %c0_i32_1 = arith.constant 0 : i32
    return %c0_i32, %c0_i32_0 : i32, i32
  }
  func.func @transform_3(%arg0: i32) -> (i32, i32) {
    %c0_i32 = arith.constant 0 : i32
    %c0_i32_0 = arith.constant 0 : i32
    %c0_i32_1 = arith.constant 0 : i32
    return %c0_i32, %c0_i32_0 : i32, i32
  }
  func.func @transform_4(%arg0: i32) -> (i32, i32) {
    %c0_i32 = arith.constant 0 : i32
    %c0_i32_0 = arith.constant 0 : i32
    %c0_i32_1 = arith.constant 0 : i32
    return %c0_i32, %c0_i32_0 : i32, i32
  }
  func.func @transform_5(%arg0: i32) -> (i32, i32) {
    %c0_i32 = arith.constant 0 : i32
    %c0_i32_0 = arith.constant 0 : i32
    %c0_i32_1 = arith.constant 0 : i32
    return %c0_i32, %c0_i32_0 : i32, i32
  }
  func.func @transform_6(%arg0: i32) -> (i32, i32) {
    %c0_i32 = arith.constant 0 : i32
    %c0_i32_0 = arith.constant 0 : i32
    %c0_i32_1 = arith.constant 0 : i32
    return %c0_i32, %c0_i32_0 : i32, i32
  }
  func.func @transform_7(%arg0: i32) -> (i32, i32) {
    %c0_i32 = arith.constant 0 : i32
    %c0_i32_0 = arith.constant 0 : i32
    return %arg0, %c0_i32 : i32, i32
  }
}

</mosaic_0001>

<bundles_post_ra>
// kernel: relation_encoder.1
= control target key start
LH: loop header
LB: loop body
LE: loop exit
PB: predicated region body
PF: predicated region fallthrough
CT: control target
= control target key end

     0   :  { %s1281_s24 = smov 0   ;;  %s1447_s0 = inlined_call_operand.vmem [shape: bf16[384,128], index: 0, kind: input, shape index: {}]   ;;  %s1448_s1 = inlined_call_operand.vmem [shape: bf16[128,128], index: 1, kind: input, shape index: {}]   ;;  %s1449_s2 = inlined_call_operand.vmem [shape: f32[1,128], index: 2, kind: input, shape index: {}]   ;;  %s1450_s3 = inlined_call_operand.vmem [shape: bf16[128,128], index: 3, kind: input, shape index: {}]   ;;  %s1451_s4 = inlined_call_operand.vmem [shape: f32[1,128], index: 4, kind: input, shape index: {}]   ;;  %s1452_s5 = inlined_call_operand.vmem [shape: bf16[128,128], index: 5, kind: input, shape index: {}]   ;;  %s1453_s6 = inlined_call_operand.vmem [shape: f32[1,128], index: 6, kind: input, shape index: {}]   ;;  %s1454_s7 = inlined_call_operand.vmem [shape: f32[384,128], index: 7, kind: output, shape index: {}]  }
   0x1 LB: > { %s987_s25 = sadd.s32 4294967295, %s1239_s24   ;;  %p991_p0 = scmp.ge.s32.totalorder %s1239_s24, 1  ;;  %s1239_s24 = sphi %s1281_s24, %s17_s24  }
   0x2   : > { %p238_p1 = scmp.lt.s32.totalorder %s1239_s24, 4 }
   0x4   : > { %p239_p2 = pnand %p991_p0, %p238_p1 }
   0x5   : > { %v1201_v0 = vld [vmem:[%s1448_s1] sm:$0xff] (!%p239_p2)   ;;  %s992_s28 = sshll.u32 (!%p239_p2), %s987_s25, 4  ;;  %v1202_v1 = vld [vmem:[%s1448_s1 + $0x8] sm:$0xff] (!%p239_p2)   ;;  %v1203_v2 = vld [vmem:[%s1448_s1 + $0x10] sm:$0xff] (!%p239_p2)  }
   0x6   : > { %242 = sbr.rel (%p239_p2) target bundleno = 726 (0x2d6), region = 48  ;;  %p271_p3 = scmp.lt.s32.totalorder (!%p239_p2), %s992_s28, 47  ;;  %1081 = vmatprep.subr.bf16.mxu0 (!%p239_p2), %v1201_v0  ;;  %v1204_v3 = vld [vmem:[%s1448_s1 + $0x18] sm:$0xff] (!%p239_p2)   ;;  %v1205_v5 = vld [vmem:[%s1448_s1 + $0x20] sm:$0xff] (!%p239_p2)   ;;  %v1206_v6 = vld [vmem:[%s1448_s1 + $0x28] sm:$0xff] (!%p239_p2)  }
   0x7   : > { %1082 = vmatpush3.bf16.msra.mxu0 (!%p239_p2), %v1201_v0  ;;  %v1217_v7 = vld [vmem:[%s1450_s3] sm:$0xff] (!%p239_p2)   ;;  %v1218_v8 = vld [vmem:[%s1450_s3 + $0x8] sm:$0xff] (!%p239_p2)   ;;  %v1207_v9 = vld [vmem:[%s1448_s1 + $0x30] sm:$0xff] (!%p239_p2)  }
   0x8   : > { %1083 = vmatprep.subr.bf16.mxu0 (!%p239_p2), %v1202_v1  ;;  %1113 = vmatprep.subr.bf16.mxu1 (!%p239_p2), %v1217_v7  ;;  %v1219_v10 = vld [vmem:[%s1450_s3 + $0x10] sm:$0xff] (!%p239_p2)   ;;  %v1208_v11 = vld [vmem:[%s1448_s1 + $0x38] sm:$0xff] (!%p239_p2)   ;;  %v1221_v13 = vld [vmem:[%s1450_s3 + $0x20] sm:$0xff] (!%p239_p2)  }
   0x9   : > { %1114 = vmatpush3.bf16.msra.mxu1 (!%p239_p2), %v1217_v7  ;;  %v1220_v12 = vld [vmem:[%s1450_s3 + $0x18] sm:$0xff] (!%p239_p2)   ;;  %v1222_v16 = vld [vmem:[%s1450_s3 + $0x28] sm:$0xff] (!%p239_p2)   ;;  %v1223_v22 = vld [vmem:[%s1450_s3 + $0x30] sm:$0xff] (!%p239_p2)  }
   0xa   : > { %1115 = vmatprep.subr.bf16.mxu1 (!%p239_p2), %v1218_v8  ;;  %v1224_v23 = vld [vmem:[%s1450_s3 + $0x38] sm:$0xff] (!%p239_p2)   ;;  %v1225_v24 = vld [vmem:[%s1452_s5] sm:$0xff] (!%p239_p2)   ;;  %v1226_v25 = vld [vmem:[%s1452_s5 + $0x8] sm:$0xff] (!%p239_p2)  }
   0xb   : > { %1084 = vmatpush3.bf16.msra.mxu0 (!%p239_p2), %v1202_v1  ;;  %v1227_v26 = vld [vmem:[%s1452_s5 + $0x10] sm:$0xff] (!%p239_p2)   ;;  %v1365_v27 = vld [vmem:[%s1452_s5 + $0x18] sm:$0xff] (!%p239_p2)   ;;  %v1371_v28 = vld [vmem:[%s1452_s5 + $0x20] sm:$0xff] (!%p239_p2)  }
   0xc   : > { %1085 = vmatprep.subr.bf16.mxu0 (!%p239_p2), %v1203_v2  ;;  %v1378_v29 = vld [vmem:[%s1452_s5 + $0x28] sm:$0xff] (!%p239_p2)   ;;  %v1386_v30 = vld [vmem:[%s1449_s2] ss:$0 sm:$0xff] (!%p239_p2) }
   0xd   : > { %s1456_s28 = smov (!%p271_p3, %s992_s28), 47  ;;  %1116 = vmatpush3.bf16.msra.mxu1 %v1218_v8 }
   0xe   : > { %s993_s10 = sshll.u32 %s1456_s28, 2  ;;  %1117 = vmatprep.subr.bf16.mxu1 %v1219_v10  ;;  %s995_s21 = sshll.u32 %s1456_s28, 3 }
   0xf   : > { %s1304_s13 = scalar_lea.vmem %s1447_s0, %s993_s10  ;;  %1086 = vmatpush3.bf16.msra.mxu0 %v1203_v2 }
  0x10   : > { %v1209_v4 = vld [vmem:[%s1304_s13] sm:$0xff]   ;;  %1087 = vmatprep.subr.bf16.mxu0 %v1204_v3  ;;  %v1210_v14 = vld [vmem:[%s1304_s13 + $0x8] sm:$0xff]   ;;  %v1211_v15 = vld [vmem:[%s1304_s13 + $0x10] sm:$0xff]  }
  0x11   : > { %1097 = vmatprep.mubr.bf16.mxu0 %v1209_v4  ;;  %1118 = vmatpush3.bf16.msra.mxu1 %v1219_v10  ;;  %v1212_v17 = vld [vmem:[%s1304_s13 + $0x18] sm:$0xff]   ;;  %v1213_v18 = vld [vmem:[%s1304_s13 + $0x20] sm:$0xff]   ;;  %v1214_v19 = vld [vmem:[%s1304_s13 + $0x28] sm:$0xff]  }
  0x12   : > { %1119 = vmatprep.subr.bf16.mxu1 %v1220_v12  ;;  %v1215_v20 = vld [vmem:[%s1304_s13 + $0x30] sm:$0xff]   ;;  %v1216_v21 = vld [vmem:[%s1304_s13 + $0x38] sm:$0xff]   ;;  %s1426_s13 = scalar_lea.vmem %s1454_s7, %s995_s21 }
  0x13   : > { %1088 = vmatpush3.bf16.msra.mxu0 %v1204_v3 }
  0x14   : > { %1089 = vmatprep.subr.bf16.mxu0 %v1205_v5 }
  0x15   : > { %1120 = vmatpush3.bf16.msra.mxu1 %v1220_v12 }
  0x16   : > { %1121 = vmatprep.subr.bf16.mxu1 %v1221_v13 }
  0x17   : > { %1090 = vmatpush3.bf16.msra.mxu0 %v1205_v5 }
  0x18   : > { %1091 = vmatprep.subr.bf16.mxu0 %v1206_v6 }
  0x19   : > { %1122 = vmatpush3.bf16.msra.mxu1 %v1221_v13 }
  0x1a   : > { %1123 = vmatprep.subr.bf16.mxu1 %v1222_v16 }
  0x1b   : > { %1092 = vmatpush3.bf16.msra.mxu0 %v1206_v6 }
  0x1c   : > { %1093 = vmatprep.subr.bf16.mxu0 %v1207_v9 }
  0x1d   : > { %1124 = vmatpush3.bf16.msra.mxu1 %v1222_v16 }
  0x1e   : > { %1125 = vmatprep.subr.bf16.mxu1 %v1223_v22 }
  0x1f   : > { %1094 = vmatpush3.bf16.msra.mxu0 %v1207_v9 }
  0x20   : > { %1095 = vmatprep.subr.bf16.mxu0 %v1208_v11 }
  0x21   : > { %1126 = vmatpush3.bf16.msra.mxu1 %v1223_v22 }
  0x22   : > { %1127 = vmatprep.subr.bf16.mxu1 %v1224_v23 }
  0x23   : > { %1096 = vmatpush3.bf16.msra.mxu0 %v1208_v11 }
  0x24   : > { %1145 = vmatprep.subr.bf16.mxu0 %v1225_v24 }
  0x25   : > { %1128 = vmatpush3.bf16.msra.mxu1 %v1224_v23  ;;  %v1231_v23 = vld [vmem:[%s1452_s5 + $0x30] sm:$0xff]  }
  0x26   : > { %1098 = vmatmul.mubr.bf16.vlgmr.msra.gmra.mrb[0].mxu0 %v1210_v14  ;;  %1177 = vmatprep.subr.bf16.mxu1 %v1225_v24 }
  0x27   : > { %1101 = vmatprep.mubr.bf16.mxu0 %v1211_v15  ;;  %1146 = vmatpush3.bf16.msra.mxu0 %v1225_v24 }
  0x28   : > { %1147 = vmatprep.subr.bf16.mxu0 %v1226_v25 }
  0x2b   : > { %1148 = vmatpush3.bf16.msra.mxu0 %v1226_v25 }
  0x2c   : > { %1149 = vmatprep.subr.bf16.mxu0 %v1227_v26 }
  0x2e   : > { %1102 = vmatmul.mubr.bf16.gmra.mrb[4].mxu0 %v1212_v17 }
  0x2f   : > { %1105 = vmatprep.mubr.bf16.mxu0 %v1213_v18  ;;  %1150 = vmatpush3.bf16.msra.mxu0 %v1227_v26 }
  0x30   : > { %1151 = vmatprep.subr.bf16.mxu0 %v1365_v27 }
  0x33   : > { %1152 = vmatpush3.bf16.msra.mxu0 %v1365_v27 }
  0x34   : > { %1153 = vmatprep.subr.bf16.mxu0 %v1371_v28 }
  0x36   : > { %1106 = vmatmul.mubr.bf16.gmra.mrb[8].mxu0 %v1214_v19 }
  0x37   : > { %1109 = vmatprep.mubr.bf16.mxu0 %v1215_v20  ;;  %1154 = vmatpush3.bf16.msra.mxu0 %v1371_v28 }
  0x38   : > { %1155 = vmatprep.subr.bf16.mxu0 %v1378_v29 }
  0x3b   : > { %1156 = vmatpush3.bf16.msra.mxu0 %v1378_v29 }
  0x3c   : > { %1157 = vmatprep.subr.bf16.mxu0 %v1231_v23 }
  0x3e   : > { %1110 = vmatmul.mubr.bf16.gmra.mrb[12].mxu0 %v1216_v21 }
  0x3f   : > { %1158 = vmatpush3.bf16.msra.mxu0 %v1231_v23 }
  0xf9   : > { %v1099_v31 = vpop.f32.mrb[0].mxu0 }
  0xfa   : > { %v461_v32 = vadd.f32 %v1099_v31, %v1386_v30  ;;  %v452_v33 = vpop.f32.mrb[1].mxu0 }
  0xfb   : > { %v453_v34 = vadd.f32 %v1386_v30, %v452_v33  ;;  %v1100_v35 = vpop.f32.mrb[2].mxu0 }
  0xfc   : > { %v464_v36 = vadd.f32 %v1100_v35, %v1386_v30  ;;  %v455_v37 = vpop.f32.mrb[3].mxu0  ;;  %v517_v39 = vmax.f32 %v461_v32, 0.0 }
  0xfd   : > { %v456_v38 = vadd.f32 %v1386_v30, %v455_v37  ;;  %v515_v41 = vmax.f32 %v453_v34, 0.0 }
  0xfe   : > { %v518_v40 = vmax.f32 %v464_v36, 0.0 }
  0xff   : > { %v516_v42 = vmax.f32 %v456_v38, 0.0 }
 0x100   : > { %v532_v43 = vpack.c.bf16 %v518_v40, %v517_v39 }
 0x101   : > { %v1103_v44 = vpop.f32.mrb[4].mxu0  ;;  %v531_v45 = vpack.c.bf16 %v516_v42, %v515_v41 }
 0x102   : > { %v477_v46 = vadd.f32 %v1103_v44, %v1386_v30  ;;  %v468_v47 = vpop.f32.mrb[5].mxu0 }
 0x103   : > { %v469_v48 = vadd.f32 %v1386_v30, %v468_v47  ;;  %v1104_v49 = vpop.f32.mrb[6].mxu0  ;;  %1129 = vmatprep.mubr.bf16.mxu1 %v531_v45 }
 0x104   : > { %v480_v50 = vadd.f32 %v1104_v49, %v1386_v30  ;;  %v471_v51 = vpop.f32.mrb[7].mxu0  ;;  %1130 = vmatmul.mubr.bf16.vlgmr.msra.gmra.mrb[0].mxu1 %v532_v43  ;;  %v521_v53 = vmax.f32 %v477_v46, 0.0 }
 0x105   : > { %v472_v52 = vadd.f32 %v1386_v30, %v471_v51  ;;  %1185 = vmatpush3.bf16.msra.mxu1 %v1225_v24  ;;  %v519_v55 = vmax.f32 %v469_v48, 0.0  ;;  %v1232_v24 = vld [vmem:[%s1452_s5 + $0x38] sm:$0xff]  }
 0x106   : > { %v522_v54 = vmax.f32 %v480_v50, 0.0  ;;  %1178 = vmatprep.subr.bf16.mxu1 %v1226_v25  ;;  %1159 = vmatprep.subr.bf16.mxu0 %v1232_v24 }
 0x107   : > { %v520_v56 = vmax.f32 %v472_v52, 0.0  ;;  %1160 = vmatpush3.bf16.msra.mxu0 %v1232_v24 }
 0x108   : > { %v534_v57 = vpack.c.bf16 %v522_v54, %v521_v53 }
 0x109   : > { %v533_v58 = vpack.c.bf16 %v520_v56, %v519_v55  ;;  %v1107_v59 = vpop.f32.mrb[8].mxu0  ;;  %1186 = vmatpush3.bf16.msra.mxu1 %v1226_v25  ;;  %v1013_v25 = vld [vmem:[%s1451_s4] ss:$0 sm:$0xff] }
 0x10a   : > { %v493_v60 = vadd.f32 %v1107_v59, %v1386_v30  ;;  %v484_v61 = vpop.f32.mrb[9].mxu0  ;;  %1179 = vmatprep.subr.bf16.mxu1 %v1227_v26 }
 0x10b   : > { %v485_v62 = vadd.f32 %v1386_v30, %v484_v61  ;;  %v1108_v63 = vpop.f32.mrb[10].mxu0  ;;  %1133 = vmatprep.mubr.bf16.mxu1 %v533_v58 }
 0x10c   : > { %v496_v0 = vadd.f32 %v1108_v63, %v1386_v30  ;;  %v487_v1 = vpop.f32.mrb[11].mxu0  ;;  %1134 = vmatmul.mubr.bf16.gmra.mrb[4].mxu1 %v534_v57  ;;  %v525_v3 = vmax.f32 %v493_v60, 0.0 }
 0x10d   : > { %v488_v2 = vadd.f32 %v1386_v30, %v487_v1  ;;  %1187 = vmatpush3.bf16.msra.mxu1 %v1227_v26  ;;  %v523_v5 = vmax.f32 %v485_v62, 0.0 }
 0x10e   : > { %v526_v4 = vmax.f32 %v496_v0, 0.0  ;;  %1180 = vmatprep.subr.bf16.mxu1 %v1365_v27 }
 0x10f   : > { %v524_v6 = vmax.f32 %v488_v2, 0.0 }
 0x110   : > { %v536_v7 = vpack.c.bf16 %v526_v4, %v525_v3 }
 0x111   : > { %v535_v8 = vpack.c.bf16 %v524_v6, %v523_v5  ;;  %v1111_v9 = vpop.f32.mrb[12].mxu0  ;;  %1188 = vmatpush3.bf16.msra.mxu1 %v1365_v27 }
 0x112   : > { %v509_v10 = vadd.f32 %v1111_v9, %v1386_v30  ;;  %v500_v11 = vpop.f32.mrb[13].mxu0  ;;  %1181 = vmatprep.subr.bf16.mxu1 %v1371_v28 }
 0x113   : > { %v501_v12 = vadd.f32 %v1386_v30, %v500_v11  ;;  %v1112_v13 = vpop.f32.mrb[14].mxu0  ;;  %1137 = vmatprep.mubr.bf16.mxu1 %v535_v8 }
 0x114   : > { %v512_v14 = vadd.f32 %v1112_v13, %v1386_v30  ;;  %v503_v15 = vpop.f32.mrb[15].mxu0  ;;  %1138 = vmatmul.mubr.bf16.gmra.mrb[8].mxu1 %v536_v7  ;;  %v529_v17 = vmax.f32 %v509_v10, 0.0 }
 0x115   : > { %v504_v16 = vadd.f32 %v1386_v30, %v503_v15  ;;  %1189 = vmatpush3.bf16.msra.mxu1 %v1371_v28  ;;  %v527_v19 = vmax.f32 %v501_v12, 0.0 }
 0x116   : > { %v530_v18 = vmax.f32 %v512_v14, 0.0  ;;  %1182 = vmatprep.subr.bf16.mxu1 %v1378_v29 }
 0x117   : > { %v528_v20 = vmax.f32 %v504_v16, 0.0 }
 0x118   : > { %v538_v21 = vpack.c.bf16 %v530_v18, %v529_v17  ;;  %v1022_v18 = vld [vmem:[%s1453_s6] ss:$0 sm:$0xff] }
 0x119   : > { %v537_v22 = vpack.c.bf16 %v528_v20, %v527_v19  ;;  %1190 = vmatpush3.bf16.msra.mxu1 %v1378_v29 }
 0x11a   : > { %1183 = vmatprep.subr.bf16.mxu1 %v1231_v23 }
 0x11b   : > { %1141 = vmatprep.mubr.bf16.mxu1 %v537_v22 }
 0x11c   : > { %1142 = vmatmul.mubr.bf16.gmra.mrb[12].mxu1 %v538_v21 }
 0x11d   : > { %1191 = vmatpush3.bf16.msra.mxu1 %v1231_v23 }
 0x11e   : > { %1184 = vmatprep.subr.bf16.mxu1 %v1232_v24 }
 0x121   : > { %1192 = vmatpush3.bf16.msra.mxu1 %v1232_v24 }
 0x1d7   : > { %v1131_v26 = vpop.f32.mrb[0].mxu1 }
 0x1d8   : > { %v653_v27 = vadd.f32 %v1131_v26, %v1013_v25  ;;  %v644_v28 = vpop.f32.mrb[1].mxu1 }
 0x1d9   : > { %v645_v29 = vadd.f32 %v1013_v25, %v644_v28  ;;  %v1132_v30 = vpop.f32.mrb[2].mxu1 }
 0x1da   : > { %v656_v31 = vadd.f32 %v1132_v30, %v1013_v25  ;;  %v647_v32 = vpop.f32.mrb[3].mxu1  ;;  %v709_v34 = vmax.f32 %v653_v27, 0.0 }
 0x1db   : > { %v648_v33 = vadd.f32 %v1013_v25, %v647_v32  ;;  %v707_v36 = vmax.f32 %v645_v29, 0.0 }
 0x1dc   : > { %v710_v35 = vmax.f32 %v656_v31, 0.0 }
 0x1dd   : > { %v708_v37 = vmax.f32 %v648_v33, 0.0 }
 0x1de   : > { %v724_v38 = vpack.c.bf16 %v710_v35, %v709_v34 }
 0x1df   : > { %v723_v39 = vpack.c.bf16 %v708_v37, %v707_v36  ;;  %v1135_v40 = vpop.f32.mrb[4].mxu1 }
 0x1e0   : > { %v669_v41 = vadd.f32 %v1135_v40, %v1013_v25  ;;  %v660_v42 = vpop.f32.mrb[5].mxu1 }
 0x1e1   : > { %v661_v43 = vadd.f32 %v1013_v25, %v660_v42  ;;  %v1136_v44 = vpop.f32.mrb[6].mxu1  ;;  %1161 = vmatprep.mubr.bf16.mxu0 %v723_v39 }
 0x1e2   : > { %v672_v45 = vadd.f32 %v1136_v44, %v1013_v25  ;;  %v663_v46 = vpop.f32.mrb[7].mxu1  ;;  %1162 = vmatmul.mubr.bf16.vlgmr.msra.gmra.mrb[16].mxu0 %v724_v38  ;;  %v713_v48 = vmax.f32 %v669_v41, 0.0 }
 0x1e3   : > { %v664_v47 = vadd.f32 %v1013_v25, %v663_v46  ;;  %v711_v50 = vmax.f32 %v661_v43, 0.0 }
 0x1e4   : > { %v714_v49 = vmax.f32 %v672_v45, 0.0 }
 0x1e5   : > { %v712_v51 = vmax.f32 %v664_v47, 0.0 }
 0x1e6   : > { %v726_v52 = vpack.c.bf16 %v714_v49, %v713_v48 }
 0x1e7   : > { %v725_v53 = vpack.c.bf16 %v712_v51, %v711_v50  ;;  %v1139_v54 = vpop.f32.mrb[8].mxu1 }
 0x1e8   : > { %v685_v55 = vadd.f32 %v1139_v54, %v1013_v25  ;;  %v676_v56 = vpop.f32.mrb[9].mxu1 }
 0x1e9   : > { %v677_v57 = vadd.f32 %v1013_v25, %v676_v56  ;;  %v1140_v58 = vpop.f32.mrb[10].mxu1  ;;  %1165 = vmatprep.mubr.bf16.mxu0 %v725_v53 }
 0x1ea   : > { %v688_v59 = vadd.f32 %v1140_v58, %v1013_v25  ;;  %v679_v60 = vpop.f32.mrb[11].mxu1  ;;  %1166 = vmatmul.mubr.bf16.gmra.mrb[20].mxu0 %v726_v52  ;;  %v717_v62 = vmax.f32 %v685_v55, 0.0 }
 0x1eb   : > { %v680_v61 = vadd.f32 %v1013_v25, %v679_v60  ;;  %v715_v0 = vmax.f32 %v677_v57, 0.0 }
 0x1ec   : > { %v718_v63 = vmax.f32 %v688_v59, 0.0 }
 0x1ed   : > { %v716_v1 = vmax.f32 %v680_v61, 0.0 }
 0x1ee   : > { %v728_v2 = vpack.c.bf16 %v718_v63, %v717_v62 }
 0x1ef   : > { %v727_v3 = vpack.c.bf16 %v716_v1, %v715_v0  ;;  %v1143_v4 = vpop.f32.mrb[12].mxu1 }
 0x1f0   : > { %v701_v5 = vadd.f32 %v1143_v4, %v1013_v25  ;;  %v692_v6 = vpop.f32.mrb[13].mxu1 }
 0x1f1   : > { %v693_v7 = vadd.f32 %v1013_v25, %v692_v6  ;;  %v1144_v8 = vpop.f32.mrb[14].mxu1  ;;  %1169 = vmatprep.mubr.bf16.mxu1 %v727_v3 }
 0x1f2   : > { %v704_v9 = vadd.f32 %v1144_v8, %v1013_v25  ;;  %v695_v10 = vpop.f32.mrb[15].mxu1  ;;  %1170 = vmatmul.mubr.bf16.vlgmr.msra.gmra.mrb[16].mxu1 %v728_v2  ;;  %v721_v12 = vmax.f32 %v701_v5, 0.0 }
 0x1f3   : > { %v696_v11 = vadd.f32 %v1013_v25, %v695_v10  ;;  %v719_v14 = vmax.f32 %v693_v7, 0.0 }
 0x1f4   : > { %v722_v13 = vmax.f32 %v704_v9, 0.0 }
 0x1f5   : > { %v720_v15 = vmax.f32 %v696_v11, 0.0 }
 0x1f6   : > { %v730_v16 = vpack.c.bf16 %v722_v13, %v721_v12 }
 0x1f7   : > { %v729_v17 = vpack.c.bf16 %v720_v15, %v719_v14 }
 0x1f9   : > { %1173 = vmatprep.mubr.bf16.mxu1 %v729_v17 }
 0x1fa   : > { %1174 = vmatmul.mubr.bf16.gmra.mrb[20].mxu1 %v730_v16 }
 0x2b5   : > { %v1163_v19 = vpop.f32.mrb[16].mxu0 }
 0x2b6   : > { %v845_v20 = vadd.f32 %v1163_v19, %v1022_v18  ;;  %v836_v21 = vpop.f32.mrb[17].mxu0 }
 0x2b7   : > { %v837_v22 = vadd.f32 %v1022_v18, %v836_v21  ;;  %v1164_v23 = vpop.f32.mrb[18].mxu0 }
 0x2b8   : > { %v901_v24 = vmax.f32 %v845_v20, 0.0  ;;  %v848_v25 = vadd.f32 %v1164_v23, %v1022_v18  ;;  %v839_v26 = vpop.f32.mrb[19].mxu0 }
 0x2b9   : > { %v899_v27 = vmax.f32 %v837_v22, 0.0  ;;  %v840_v28 = vadd.f32 %v1022_v18, %v839_v26 }
 0x2ba   : > { %917 = vst [vmem:[%s1426_s13 + $0x10] sm:$0xff] %v901_v24  ;;  %v902_v29 = vmax.f32 %v848_v25, 0.0 }
 0x2bb   : > { %915 = vst [vmem:[%s1426_s13] sm:$0xff] %v899_v27  ;;  %v900_v30 = vmax.f32 %v840_v28, 0.0 }
 0x2bc   : > { %918 = vst [vmem:[%s1426_s13 + $0x18] sm:$0xff] %v902_v29 }
 0x2bd   : > { %916 = vst [vmem:[%s1426_s13 + $0x8] sm:$0xff] %v900_v30  ;;  %v1167_v31 = vpop.f32.mrb[20].mxu0 }
 0x2be   : > { %v861_v32 = vadd.f32 %v1167_v31, %v1022_v18  ;;  %v852_v33 = vpop.f32.mrb[21].mxu0 }
 0x2bf   : > { %v853_v34 = vadd.f32 %v1022_v18, %v852_v33  ;;  %v1168_v35 = vpop.f32.mrb[22].mxu0 }
 0x2c0   : > { %v905_v36 = vmax.f32 %v861_v32, 0.0  ;;  %v864_v37 = vadd.f32 %v1168_v35, %v1022_v18  ;;  %v855_v38 = vpop.f32.mrb[23].mxu0 }
 0x2c1   : > { %v903_v39 = vmax.f32 %v853_v34, 0.0  ;;  %v856_v40 = vadd.f32 %v1022_v18, %v855_v38 }
 0x2c2   : > { %921 = vst [vmem:[%s1426_s13 + $0x30] sm:$0xff] %v905_v36  ;;  %v906_v41 = vmax.f32 %v864_v37, 0.0 }
 0x2c3   : > { %919 = vst [vmem:[%s1426_s13 + $0x20] sm:$0xff] %v903_v39  ;;  %v904_v42 = vmax.f32 %v856_v40, 0.0 }
 0x2c4   : > { %922 = vst [vmem:[%s1426_s13 + $0x38] sm:$0xff] %v906_v41 }
 0x2c5   : > { %920 = vst [vmem:[%s1426_s13 + $0x28] sm:$0xff] %v904_v42  ;;  %v1171_v43 = vpop.f32.mrb[16].mxu1 }
 0x2c6   : > { %v877_v44 = vadd.f32 %v1171_v43, %v1022_v18  ;;  %v868_v45 = vpop.f32.mrb[17].mxu1 }
 0x2c7   : > { %v869_v46 = vadd.f32 %v1022_v18, %v868_v45  ;;  %v1172_v47 = vpop.f32.mrb[18].mxu1 }
 0x2c8   : > { %v909_v48 = vmax.f32 %v877_v44, 0.0  ;;  %v880_v49 = vadd.f32 %v1172_v47, %v1022_v18  ;;  %v871_v50 = vpop.f32.mrb[19].mxu1 }
 0x2c9   : > { %v907_v51 = vmax.f32 %v869_v46, 0.0  ;;  %v872_v52 = vadd.f32 %v1022_v18, %v871_v50 }
 0x2ca   : > { %925 = vst [vmem:[%s1426_s13 + $0x50] sm:$0xff] %v909_v48  ;;  %v910_v53 = vmax.f32 %v880_v49, 0.0 }
 0x2cb   : > { %923 = vst [vmem:[%s1426_s13 + $0x40] sm:$0xff] %v907_v51  ;;  %v908_v54 = vmax.f32 %v872_v52, 0.0 }
 0x2cc   : > { %926 = vst [vmem:[%s1426_s13 + $0x58] sm:$0xff] %v910_v53 }
 0x2cd   : > { %924 = vst [vmem:[%s1426_s13 + $0x48] sm:$0xff] %v908_v54  ;;  %v1175_v55 = vpop.f32.mrb[20].mxu1 }
 0x2ce   : > { %v893_v56 = vadd.f32 %v1175_v55, %v1022_v18  ;;  %v884_v57 = vpop.f32.mrb[21].mxu1 }
 0x2cf   : > { %v885_v58 = vadd.f32 %v1022_v18, %v884_v57  ;;  %v1176_v59 = vpop.f32.mrb[22].mxu1 }
 0x2d0   : > { %v913_v60 = vmax.f32 %v893_v56, 0.0  ;;  %v896_v61 = vadd.f32 %v1176_v59, %v1022_v18  ;;  %v887_v62 = vpop.f32.mrb[23].mxu1 }
 0x2d1   : > { %v911_v63 = vmax.f32 %v885_v58, 0.0  ;;  %v888_v0 = vadd.f32 %v1022_v18, %v887_v62 }
 0x2d2   : > { %929 = vst [vmem:[%s1426_s13 + $0x70] sm:$0xff] %v913_v60  ;;  %v914_v1 = vmax.f32 %v896_v61, 0.0 }
 0x2d3   : > { %927 = vst [vmem:[%s1426_s13 + $0x60] sm:$0xff] %v911_v63  ;;  %v912_v2 = vmax.f32 %v888_v0, 0.0 }
 0x2d4   : > { %930 = vst [vmem:[%s1426_s13 + $0x78] sm:$0xff] %v914_v1 }
 0x2d5   : > { %928 = vst [vmem:[%s1426_s13 + $0x68] sm:$0xff] %v912_v2 }
 0x2d6 PF: > { %s17_s24 = sadd.s32 1, %s1239_s24  }
 0x2d7   : > { %p14_p4 = scmp.ge.s32.totalorder %s17_s24, 5  }
 0x2d9   :  { %16 = sbr.rel (!%p14_p4) target bundleno = 1 (0x1), region = 78 }

</bundles_post_ra>
